<compile_context>
chip_gen: v7x
topology: tpu7x:2x2x1
jax: 0.10.0
libtpu: 0.0.40
codegen_flags: <defaults>
</compile_context>

<pallas_src>
import functools

import jax
import jax.numpy as jnp
from jax.experimental import pallas as pl
from jax.experimental.pallas import tpu as pltpu


def _mhsa_kernel(num_heads, embed_size,
                 k_ref, q_ref, v_ref, mask_ref,
                 wk_ref, wq_ref, wv_ref,
                 bk_ref, bq_ref, bv_ref,
                 wf_ref, bf_ref,
                 o_ref):
    """One batch-block per grid step.

    k_ref/q_ref/v_ref : (B, L, E) VMEM tiles (compute dtype)
    mask_ref          : (B, Q, K)
    wk/wq/wv_ref      : (E, E) block-diagonal, pre-transposed (x @ W);
                        wq/bq already carry the 1/sqrt(E) attention scale
    bk/bq/bv_ref      : (1, E) head-tiled biases (f32)
    wf_ref            : (E, E) pre-transposed final projection
    bf_ref            : (1, E) (f32)
    o_ref             : (B, Q, E) f32
    """
    H = num_heads
    E = embed_size
    D = E // H

    B, K_len, _ = k_ref.shape
    Q_len = q_ref.shape[1]
    mxu_dtype = wk_ref.dtype

    key = k_ref[...]      # (B, K, E)
    query = q_ref[...]    # (B, Q, E)
    value = v_ref[...]    # (B, K, E)

    # ---- Fused Q/K/V projections: one matmul per tensor over all samples/heads.
    k2 = key.reshape(B * K_len, E)
    q2 = query.reshape(B * Q_len, E)
    v2 = value.reshape(B * K_len, E)

    kp = (jnp.dot(k2, wk_ref[...], preferred_element_type=jnp.float32)
          + bk_ref[...]).astype(mxu_dtype)
    qp = (jnp.dot(q2, wq_ref[...], preferred_element_type=jnp.float32)
          + bq_ref[...]).astype(mxu_dtype)
    vp = (jnp.dot(v2, wv_ref[...], preferred_element_type=jnp.float32)
          + bv_ref[...]).astype(mxu_dtype)

    kp3 = kp.reshape(B, K_len, E)
    qp3 = qp.reshape(B, Q_len, E)
    vp3 = vp.reshape(B, K_len, E)

    # Hoisted, head-invariant mask predicate (compare once per grid step).
    neg_mask = mask_ref[...] == 0              # (B, Q, K) bool
    fill = jnp.float32(-1e-30)                 # exact PyTorch masked_fill value

    # ---- Attention per head, batched over B (flash-style 3-D einsums).
    # Note: 1/sqrt(E) is already folded into qp via the wrapper.
    head_outs = []
    for h in range(H):  # static, small (H=4); projections already fused above
        qh = qp3[:, :, h * D:(h + 1) * D]      # (B, Q, D)
        kh = kp3[:, :, h * D:(h + 1) * D]      # (B, K, D)
        vh = vp3[:, :, h * D:(h + 1) * D]      # (B, K, D)

        s = jnp.einsum('bqd,bkd->bqk', qh, kh,
                       preferred_element_type=jnp.float32)
        s = jnp.where(neg_mask, fill, s)

        m = jnp.max(s, axis=-1, keepdims=True)
        e = jnp.exp(s - m)
        denom = jnp.sum(e, axis=-1, keepdims=True)
        p = (e * pl.reciprocal(denom, approx=True)).astype(mxu_dtype)

        head_outs.append(
            jnp.einsum('bqk,bkd->bqd', p, vh,
                       preferred_element_type=jnp.float32).astype(mxu_dtype))

    concat = jnp.concatenate(head_outs, axis=-1)        # (B, Q, E)

    # ---- Single final projection over a row-dense (B*Q, E) slab.
    flat = concat.reshape(B * Q_len, E)
    out = (jnp.dot(flat, wf_ref[...], preferred_element_type=jnp.float32)
           + bf_ref[...])
    o_ref[...] = out.reshape(B, Q_len, E).astype(o_ref.dtype)


def mhsa_pallas(key, query, value, mask, params, num_heads, *,
                compute_dtype=jnp.float32, batch_block=None):
    """compute_dtype: MXU operand dtype (use jnp.bfloat16 on v6e/v7x).
    Accumulation and softmax are always f32; output is f32."""
    N, K_len, E = key.shape
    Q_len = query.shape[1]
    H = num_heads
    D = E // H
    assert key.shape[1] == value.shape[1], "Key and Value length must be same"

    B = N if batch_block is None else batch_block
    assert N % B == 0, "batch_block must divide N"
    cd = compute_dtype
    inv_scale = 1.0 / (E ** 0.5)

    # Block-diagonal, pre-transposed projection weights (built once in the
    # wrapper; applying them to (L, E) == applying the shared (D,D) Linear per
    # head).  `scale` lets us fold 1/sqrt(E) into the query projection.
    def blockdiag_t(w, scale=1.0):
        wt = (w.T * scale).astype(cd)                     # (D, D)
        blk = jnp.zeros((E, E), cd)
        for h in range(H):
            blk = blk.at[h * D:(h + 1) * D, h * D:(h + 1) * D].set(wt)
        return blk

    wk_t = blockdiag_t(params["wk"])
    wq_t = blockdiag_t(params["wq"], scale=inv_scale)     # scale folded in
    wv_t = blockdiag_t(params["wv"])
    wf_t = params["wf"].T.astype(cd)                      # (E, E) pre-transposed

    bk_e = jnp.tile(params["bk"].astype(jnp.float32), (1, H))               # (1, E)
    bq_e = jnp.tile(params["bq"].astype(jnp.float32) * inv_scale, (1, H))   # scaled
    bv_e = jnp.tile(params["bv"].astype(jnp.float32), (1, H))
    bf = params["bf"].astype(jnp.float32)                                   # (1, E)

    # Squeeze the head axis of the mask once in the wrapper (head-invariant).
    mask3 = jnp.broadcast_to(mask, (N, 1, Q_len, K_len)).reshape(
        N, Q_len, K_len).astype(cd)

    key_c = key.astype(cd)
    query_c = query.astype(cd)
    value_c = value.astype(cd)

    kernel = functools.partial(_mhsa_kernel, H, E)

    grid_spec = pltpu.PrefetchScalarGridSpec(
        num_scalar_prefetch=0,
        grid=(N // B,),
        in_specs=[
            pl.BlockSpec((B, K_len, E), lambda n: (n, 0, 0)),      # key
            pl.BlockSpec((B, Q_len, E), lambda n: (n, 0, 0)),      # query
            pl.BlockSpec((B, K_len, E), lambda n: (n, 0, 0)),      # value
            pl.BlockSpec((B, Q_len, K_len), lambda n: (n, 0, 0)),  # mask
            pl.BlockSpec((E, E), lambda n: (0, 0)),                # wk (blockdiag, T)
            pl.BlockSpec((E, E), lambda n: (0, 0)),                # wq (scaled)
            pl.BlockSpec((E, E), lambda n: (0, 0)),                # wv
            pl.BlockSpec((1, E), lambda n: (0, 0)),                # bk (tiled)
            pl.BlockSpec((1, E), lambda n: (0, 0)),                # bq (scaled)
            pl.BlockSpec((1, E), lambda n: (0, 0)),                # bv
            pl.BlockSpec((E, E), lambda n: (0, 0)),                # wf (T)
            pl.BlockSpec((1, E), lambda n: (0, 0)),                # bf
        ],
        out_specs=pl.BlockSpec((B, Q_len, E), lambda n: (n, 0, 0)),
    )

    return pl.pallas_call(
        kernel,
        out_shape=jax.ShapeDtypeStruct((N, Q_len, E), jnp.float32),
        grid_spec=grid_spec,
        compiler_params=pltpu.CompilerParams(
            dimension_semantics=("parallel",)),
    )(key_c, query_c, value_c, mask3,
      wk_t, wq_t, wv_t, bk_e, bq_e, bv_e, wf_t, bf)


def mhsa_reference(key, query, value, mask, params, num_heads):
    """Pure-JAX re-statement of the PyTorch forward, for verification."""
    N, K_len, E = key.shape
    Q_len = query.shape[1]
    H, D = num_heads, E // num_heads

    q = query.reshape(N, Q_len, H, D)
    k = key.reshape(N, K_len, H, D)
    v = value.reshape(N, K_len, H, D)

    k = jnp.einsum("nkhd,od->nkho", k, params["wk"]) + params["bk"]
    q = jnp.einsum("nqhd,od->nqho", q, params["wq"]) + params["bq"]
    v = jnp.einsum("nkhd,od->nkho", v, params["wv"]) + params["bv"]

    s = jnp.einsum("nqhd,nkhd->nhqk", q, k) / (E ** 0.5)
    s = jnp.where(mask == 0, jnp.float32(-1e-30), s)
    sm = jax.nn.softmax(s, axis=3)
    o = jnp.einsum("nhqk,nkhd->nqhd", sm, v).reshape(N, Q_len, E)
    return o @ params["wf"].T + params["bf"]


if __name__ == "__main__":
    # Small shapes consistent with the module.
    N = 2
    seq = 8          # key_len == query_len == value_len
    embed_size = 32
    num_heads = 4
    head_size = embed_size // num_heads

    root = jax.random.PRNGKey(0)
    keys = jax.random.split(root, 12)

    def init_linear(kw, kb, out_f, in_f):
        # Deterministic small-scale init (synthetic weights; not a checkpoint load).
        w = jax.random.normal(kw, (out_f, in_f), jnp.float32) * 0.1
        b = jax.random.normal(kb, (1, out_f), jnp.float32) * 0.1
        return w, b

    wk, bk = init_linear(keys[0], keys[1], head_size, head_size)
    wq, bq = init_linear(keys[2], keys[3], head_size, head_size)
    wv, bv = init_linear(keys[4], keys[5], head_size, head_size)
    wf, bf = init_linear(keys[6], keys[7], embed_size, embed_size)
    params = dict(wk=wk, bk=bk, wq=wq, bq=bq, wv=wv, bv=bv, wf=wf, bf=bf)

    key_in = jax.random.normal(keys[8], (N, seq, embed_size), jnp.float32)
    query_in = jax.random.normal(keys[9], (N, seq, embed_size), jnp.float32)
    value_in = jax.random.normal(keys[10], (N, seq, embed_size), jnp.float32)
    mask = (jax.random.uniform(keys[11], (N, 1, seq, seq)) > 0.2).astype(jnp.float32)

    ref = mhsa_reference(key_in, query_in, value_in, mask, params, num_heads)

    # f32 path (tolerance loosened only for the approx EUP reciprocal in softmax).
    out_f32 = mhsa_pallas(key_in, query_in, value_in, mask, params, num_heads,
                          compute_dtype=jnp.float32)
    out_f32 = jax.block_until_ready(out_f32)
    assert out_f32.shape == (N, seq, embed_size)
    assert jnp.allclose(out_f32, ref, atol=3e-3, rtol=3e-3), \
        f"f32 max abs err = {jnp.max(jnp.abs(out_f32 - ref))}"

    # bf16 MXU-operand path (recommended on v6e/v7x); softmax/accumulation stay f32.
    out_bf16 = mhsa_pallas(key_in, query_in, value_in, mask, params, num_heads,
                           compute_dtype=jnp.bfloat16)
    out_bf16 = jax.block_until_ready(out_bf16)
    assert jnp.allclose(out_bf16, ref, atol=1e-1, rtol=1e-1), \
        f"bf16 max abs err = {jnp.max(jnp.abs(out_bf16 - ref))}"

    print("KERNEL_OK")
</pallas_src>

<mosaic_0001>
module attributes {stable_mosaic.version = 11 : i64} {
  func.func @_mhsa_kernel(%arg0: i32, %arg1: memref<2x8x32xf32, #tpu.memory_space<vmem>>, %arg2: memref<2x8x32xf32, #tpu.memory_space<vmem>>, %arg3: memref<2x8x32xf32, #tpu.memory_space<vmem>>, %arg4: memref<2x8x8xf32, #tpu.memory_space<vmem>>, %arg5: memref<32x32xf32, #tpu.memory_space<vmem>>, %arg6: memref<32x32xf32, #tpu.memory_space<vmem>>, %arg7: memref<32x32xf32, #tpu.memory_space<vmem>>, %arg8: memref<1x32xf32, #tpu.memory_space<vmem>>, %arg9: memref<1x32xf32, #tpu.memory_space<vmem>>, %arg10: memref<1x32xf32, #tpu.memory_space<vmem>>, %arg11: memref<32x32xf32, #tpu.memory_space<vmem>>, %arg12: memref<1x32xf32, #tpu.memory_space<vmem>>, %arg13: memref<2x8x32xf32, #tpu.memory_space<vmem>>) attributes {dimension_semantics = [#tpu.dimension_semantics<parallel>], iteration_bounds = array<i64: 1>, scalar_prefetch = 0 : i64, scratch_operands = 0 : i64, tpu.core_type = #tpu.core_type<tc>, window_params = [{transform_indices = @transform_0, window_bounds = array<i64: 2, 8, 32>}, {transform_indices = @transform_1, window_bounds = array<i64: 2, 8, 32>}, {transform_indices = @transform_2, window_bounds = array<i64: 2, 8, 32>}, {transform_indices = @transform_3, window_bounds = array<i64: 2, 8, 8>}, {pipeline_mode = #tpu.pipeline_mode<synchronous>, transform_indices = @transform_4, window_bounds = array<i64: 32, 32>}, {pipeline_mode = #tpu.pipeline_mode<synchronous>, transform_indices = @transform_5, window_bounds = array<i64: 32, 32>}, {pipeline_mode = #tpu.pipeline_mode<synchronous>, transform_indices = @transform_6, window_bounds = array<i64: 32, 32>}, {pipeline_mode = #tpu.pipeline_mode<synchronous>, transform_indices = @transform_7, window_bounds = array<i64: 1, 32>}, {pipeline_mode = #tpu.pipeline_mode<synchronous>, transform_indices = @transform_8, window_bounds = array<i64: 1, 32>}, {pipeline_mode = #tpu.pipeline_mode<synchronous>, transform_indices = @transform_9, window_bounds = array<i64: 1, 32>}, {pipeline_mode = #tpu.pipeline_mode<synchronous>, transform_indices = @transform_10, window_bounds = array<i64: 32, 32>}, {pipeline_mode = #tpu.pipeline_mode<synchronous>, transform_indices = @transform_11, window_bounds = array<i64: 1, 32>}, {transform_indices = @transform_12, window_bounds = array<i64: 2, 8, 32>}]} {
    %c0 = arith.constant 0 : index
    %c0_0 = arith.constant 0 : index
    %c0_1 = arith.constant 0 : index
    %0 = vector.load %arg1[%c0, %c0_0, %c0_1] : memref<2x8x32xf32, #tpu.memory_space<vmem>>, vector<2x8x32xf32>
    %c0_2 = arith.constant 0 : index
    %c0_3 = arith.constant 0 : index
    %c0_4 = arith.constant 0 : index
    %1 = vector.load %arg2[%c0_2, %c0_3, %c0_4] : memref<2x8x32xf32, #tpu.memory_space<vmem>>, vector<2x8x32xf32>
    %c0_5 = arith.constant 0 : index
    %c0_6 = arith.constant 0 : index
    %c0_7 = arith.constant 0 : index
    %2 = vector.load %arg3[%c0_5, %c0_6, %c0_7] : memref<2x8x32xf32, #tpu.memory_space<vmem>>, vector<2x8x32xf32>
    %3 = vector.shape_cast %0 : vector<2x8x32xf32> to vector<16x32xf32>
    %4 = vector.shape_cast %1 : vector<2x8x32xf32> to vector<16x32xf32>
    %5 = vector.shape_cast %2 : vector<2x8x32xf32> to vector<16x32xf32>
    %c0_8 = arith.constant 0 : index
    %c0_9 = arith.constant 0 : index
    %6 = vector.load %arg5[%c0_8, %c0_9] : memref<32x32xf32, #tpu.memory_space<vmem>>, vector<32x32xf32>
    %cst = arith.constant dense<0.000000e+00> : vector<16x32xf32>
    %7 = tpu.matmul %3, %6, %cst {dimension_numbers = #tpu.dot_dimension_numbers<[1], [0], [0], [1], [0, 0, 1, 1], [], []>} : vector<16x32xf32>, vector<32x32xf32>, vector<16x32xf32> -> vector<16x32xf32>
    %c0_10 = arith.constant 0 : index
    %c0_11 = arith.constant 0 : index
    %8 = vector.load %arg8[%c0_10, %c0_11] : memref<1x32xf32, #tpu.memory_space<vmem>>, vector<1x32xf32>
    %9 = vector.broadcast %8 : vector<1x32xf32> to vector<16x32xf32>
    %10 = arith.addf %7, %9 : vector<16x32xf32>
    %c0_12 = arith.constant 0 : index
    %c0_13 = arith.constant 0 : index
    %11 = vector.load %arg6[%c0_12, %c0_13] : memref<32x32xf32, #tpu.memory_space<vmem>>, vector<32x32xf32>
    %cst_14 = arith.constant dense<0.000000e+00> : vector<16x32xf32>
    %12 = tpu.matmul %4, %11, %cst_14 {dimension_numbers = #tpu.dot_dimension_numbers<[1], [0], [0], [1], [0, 0, 1, 1], [], []>} : vector<16x32xf32>, vector<32x32xf32>, vector<16x32xf32> -> vector<16x32xf32>
    %c0_15 = arith.constant 0 : index
    %c0_16 = arith.constant 0 : index
    %13 = vector.load %arg9[%c0_15, %c0_16] : memref<1x32xf32, #tpu.memory_space<vmem>>, vector<1x32xf32>
    %14 = vector.broadcast %13 : vector<1x32xf32> to vector<16x32xf32>
    %15 = arith.addf %12, %14 : vector<16x32xf32>
    %c0_17 = arith.constant 0 : index
    %c0_18 = arith.constant 0 : index
    %16 = vector.load %arg7[%c0_17, %c0_18] : memref<32x32xf32, #tpu.memory_space<vmem>>, vector<32x32xf32>
    %cst_19 = arith.constant dense<0.000000e+00> : vector<16x32xf32>
    %17 = tpu.matmul %5, %16, %cst_19 {dimension_numbers = #tpu.dot_dimension_numbers<[1], [0], [0], [1], [0, 0, 1, 1], [], []>} : vector<16x32xf32>, vector<32x32xf32>, vector<16x32xf32> -> vector<16x32xf32>
    %c0_20 = arith.constant 0 : index
    %c0_21 = arith.constant 0 : index
    %18 = vector.load %arg10[%c0_20, %c0_21] : memref<1x32xf32, #tpu.memory_space<vmem>>, vector<1x32xf32>
    %19 = vector.broadcast %18 : vector<1x32xf32> to vector<16x32xf32>
    %20 = arith.addf %17, %19 : vector<16x32xf32>
    %21 = vector.shape_cast %10 : vector<16x32xf32> to vector<2x8x32xf32>
    %22 = vector.shape_cast %15 : vector<16x32xf32> to vector<2x8x32xf32>
    %23 = vector.shape_cast %20 : vector<16x32xf32> to vector<2x8x32xf32>
    %c0_22 = arith.constant 0 : index
    %c0_23 = arith.constant 0 : index
    %c0_24 = arith.constant 0 : index
    %24 = vector.load %arg4[%c0_22, %c0_23, %c0_24] : memref<2x8x8xf32, #tpu.memory_space<vmem>>, vector<2x8x8xf32>
    %cst_25 = arith.constant 0.000000e+00 : f32
    %25 = vector.broadcast %cst_25 : f32 to vector<2x8x8xf32>
    %26 = arith.cmpf oeq, %24, %25 : vector<2x8x8xf32>
    %27 = vector.extract_strided_slice %22 {offsets = [0, 0, 0], sizes = [2, 8, 8], strides = [1, 1, 1]} : vector<2x8x32xf32> to vector<2x8x8xf32>
    %28 = vector.extract_strided_slice %21 {offsets = [0, 0, 0], sizes = [2, 8, 8], strides = [1, 1, 1]} : vector<2x8x32xf32> to vector<2x8x8xf32>
    %29 = vector.extract_strided_slice %23 {offsets = [0, 0, 0], sizes = [2, 8, 8], strides = [1, 1, 1]} : vector<2x8x32xf32> to vector<2x8x8xf32>
    "tpu.trace_start"() <{level = 10 : i32, message = "bqd,bkd->bqk"}> : () -> ()
    %cst_26 = arith.constant dense<0.000000e+00> : vector<2x8x8xf32>
    %30 = tpu.matmul %27, %28, %cst_26 {dimension_numbers = #tpu.dot_dimension_numbers<[2], [2], [1], [1], [0, 0, 0, 1, 1, 1], [0], [0]>} : vector<2x8x8xf32>, vector<2x8x8xf32>, vector<2x8x8xf32> -> vector<2x8x8xf32>
    %cst_27 = arith.constant -1.000000e-30 : f32
    "tpu.trace_stop"() : () -> ()
    %31 = vector.broadcast %cst_27 : f32 to vector<2x8x8xf32>
    %32 = arith.select %26, %31, %30 : vector<2x8x8xi1>, vector<2x8x8xf32>
    %cst_28 = arith.constant dense<0xFF800000> : vector<2x8xf32>
    %33 = vector.multi_reduction <maximumf>, %32, %cst_28 [2] : vector<2x8x8xf32> to vector<2x8xf32>
    %34 = vector.shape_cast %33 : vector<2x8xf32> to vector<2x8x1xf32>
    %35 = vector.broadcast %34 : vector<2x8x1xf32> to vector<2x8x8xf32>
    %36 = arith.subf %32, %35 : vector<2x8x8xf32>
    %37 = math.exp %36 : vector<2x8x8xf32>
    %cst_29 = arith.constant dense<0.000000e+00> : vector<2x8xf32>
    %38 = vector.multi_reduction <add>, %37, %cst_29 [2] : vector<2x8x8xf32> to vector<2x8xf32>
    %39 = vector.shape_cast %38 : vector<2x8xf32> to vector<2x8x1xf32>
    %40 = tpu.reciprocal %39 {approx = true} : vector<2x8x1xf32> -> vector<2x8x1xf32>
    %41 = vector.broadcast %40 : vector<2x8x1xf32> to vector<2x8x8xf32>
    %42 = arith.mulf %37, %41 : vector<2x8x8xf32>
    "tpu.trace_start"() <{level = 10 : i32, message = "bqk,bkd->bqd"}> : () -> ()
    %cst_30 = arith.constant dense<0.000000e+00> : vector<2x8x8xf32>
    %43 = tpu.matmul %42, %29, %cst_30 {dimension_numbers = #tpu.dot_dimension_numbers<[2], [1], [1], [2], [0, 0, 0, 1, 1, 2], [0], [0]>} : vector<2x8x8xf32>, vector<2x8x8xf32>, vector<2x8x8xf32> -> vector<2x8x8xf32>
    "tpu.trace_stop"() : () -> ()
    %44 = vector.extract_strided_slice %22 {offsets = [0, 0, 8], sizes = [2, 8, 8], strides = [1, 1, 1]} : vector<2x8x32xf32> to vector<2x8x8xf32>
    %45 = vector.extract_strided_slice %21 {offsets = [0, 0, 8], sizes = [2, 8, 8], strides = [1, 1, 1]} : vector<2x8x32xf32> to vector<2x8x8xf32>
    %46 = vector.extract_strided_slice %23 {offsets = [0, 0, 8], sizes = [2, 8, 8], strides = [1, 1, 1]} : vector<2x8x32xf32> to vector<2x8x8xf32>
    "tpu.trace_start"() <{level = 10 : i32, message = "bqd,bkd->bqk"}> : () -> ()
    %cst_31 = arith.constant dense<0.000000e+00> : vector<2x8x8xf32>
    %47 = tpu.matmul %44, %45, %cst_31 {dimension_numbers = #tpu.dot_dimension_numbers<[2], [2], [1], [1], [0, 0, 0, 1, 1, 1], [0], [0]>} : vector<2x8x8xf32>, vector<2x8x8xf32>, vector<2x8x8xf32> -> vector<2x8x8xf32>
    %cst_32 = arith.constant -1.000000e-30 : f32
    "tpu.trace_stop"() : () -> ()
    %48 = vector.broadcast %cst_32 : f32 to vector<2x8x8xf32>
    %49 = arith.select %26, %48, %47 : vector<2x8x8xi1>, vector<2x8x8xf32>
    %cst_33 = arith.constant dense<0xFF800000> : vector<2x8xf32>
    %50 = vector.multi_reduction <maximumf>, %49, %cst_33 [2] : vector<2x8x8xf32> to vector<2x8xf32>
    %51 = vector.shape_cast %50 : vector<2x8xf32> to vector<2x8x1xf32>
    %52 = vector.broadcast %51 : vector<2x8x1xf32> to vector<2x8x8xf32>
    %53 = arith.subf %49, %52 : vector<2x8x8xf32>
    %54 = math.exp %53 : vector<2x8x8xf32>
    %cst_34 = arith.constant dense<0.000000e+00> : vector<2x8xf32>
    %55 = vector.multi_reduction <add>, %54, %cst_34 [2] : vector<2x8x8xf32> to vector<2x8xf32>
    %56 = vector.shape_cast %55 : vector<2x8xf32> to vector<2x8x1xf32>
    %57 = tpu.reciprocal %56 {approx = true} : vector<2x8x1xf32> -> vector<2x8x1xf32>
    %58 = vector.broadcast %57 : vector<2x8x1xf32> to vector<2x8x8xf32>
    %59 = arith.mulf %54, %58 : vector<2x8x8xf32>
    "tpu.trace_start"() <{level = 10 : i32, message = "bqk,bkd->bqd"}> : () -> ()
    %cst_35 = arith.constant dense<0.000000e+00> : vector<2x8x8xf32>
    %60 = tpu.matmul %59, %46, %cst_35 {dimension_numbers = #tpu.dot_dimension_numbers<[2], [1], [1], [2], [0, 0, 0, 1, 1, 2], [0], [0]>} : vector<2x8x8xf32>, vector<2x8x8xf32>, vector<2x8x8xf32> -> vector<2x8x8xf32>
    "tpu.trace_stop"() : () -> ()
    %61 = vector.extract_strided_slice %22 {offsets = [0, 0, 16], sizes = [2, 8, 8], strides = [1, 1, 1]} : vector<2x8x32xf32> to vector<2x8x8xf32>
    %62 = vector.extract_strided_slice %21 {offsets = [0, 0, 16], sizes = [2, 8, 8], strides = [1, 1, 1]} : vector<2x8x32xf32> to vector<2x8x8xf32>
    %63 = vector.extract_strided_slice %23 {offsets = [0, 0, 16], sizes = [2, 8, 8], strides = [1, 1, 1]} : vector<2x8x32xf32> to vector<2x8x8xf32>
    "tpu.trace_start"() <{level = 10 : i32, message = "bqd,bkd->bqk"}> : () -> ()
    %cst_36 = arith.constant dense<0.000000e+00> : vector<2x8x8xf32>
    %64 = tpu.matmul %61, %62, %cst_36 {dimension_numbers = #tpu.dot_dimension_numbers<[2], [2], [1], [1], [0, 0, 0, 1, 1, 1], [0], [0]>} : vector<2x8x8xf32>, vector<2x8x8xf32>, vector<2x8x8xf32> -> vector<2x8x8xf32>
    %cst_37 = arith.constant -1.000000e-30 : f32
    "tpu.trace_stop"() : () -> ()
    %65 = vector.broadcast %cst_37 : f32 to vector<2x8x8xf32>
    %66 = arith.select %26, %65, %64 : vector<2x8x8xi1>, vector<2x8x8xf32>
    %cst_38 = arith.constant dense<0xFF800000> : vector<2x8xf32>
    %67 = vector.multi_reduction <maximumf>, %66, %cst_38 [2] : vector<2x8x8xf32> to vector<2x8xf32>
    %68 = vector.shape_cast %67 : vector<2x8xf32> to vector<2x8x1xf32>
    %69 = vector.broadcast %68 : vector<2x8x1xf32> to vector<2x8x8xf32>
    %70 = arith.subf %66, %69 : vector<2x8x8xf32>
    %71 = math.exp %70 : vector<2x8x8xf32>
    %cst_39 = arith.constant dense<0.000000e+00> : vector<2x8xf32>
    %72 = vector.multi_reduction <add>, %71, %cst_39 [2] : vector<2x8x8xf32> to vector<2x8xf32>
    %73 = vector.shape_cast %72 : vector<2x8xf32> to vector<2x8x1xf32>
    %74 = tpu.reciprocal %73 {approx = true} : vector<2x8x1xf32> -> vector<2x8x1xf32>
    %75 = vector.broadcast %74 : vector<2x8x1xf32> to vector<2x8x8xf32>
    %76 = arith.mulf %71, %75 : vector<2x8x8xf32>
    "tpu.trace_start"() <{level = 10 : i32, message = "bqk,bkd->bqd"}> : () -> ()
    %cst_40 = arith.constant dense<0.000000e+00> : vector<2x8x8xf32>
    %77 = tpu.matmul %76, %63, %cst_40 {dimension_numbers = #tpu.dot_dimension_numbers<[2], [1], [1], [2], [0, 0, 0, 1, 1, 2], [0], [0]>} : vector<2x8x8xf32>, vector<2x8x8xf32>, vector<2x8x8xf32> -> vector<2x8x8xf32>
    "tpu.trace_stop"() : () -> ()
    %78 = vector.extract_strided_slice %22 {offsets = [0, 0, 24], sizes = [2, 8, 8], strides = [1, 1, 1]} : vector<2x8x32xf32> to vector<2x8x8xf32>
    %79 = vector.extract_strided_slice %21 {offsets = [0, 0, 24], sizes = [2, 8, 8], strides = [1, 1, 1]} : vector<2x8x32xf32> to vector<2x8x8xf32>
    %80 = vector.extract_strided_slice %23 {offsets = [0, 0, 24], sizes = [2, 8, 8], strides = [1, 1, 1]} : vector<2x8x32xf32> to vector<2x8x8xf32>
    "tpu.trace_start"() <{level = 10 : i32, message = "bqd,bkd->bqk"}> : () -> ()
    %cst_41 = arith.constant dense<0.000000e+00> : vector<2x8x8xf32>
    %81 = tpu.matmul %78, %79, %cst_41 {dimension_numbers = #tpu.dot_dimension_numbers<[2], [2], [1], [1], [0, 0, 0, 1, 1, 1], [0], [0]>} : vector<2x8x8xf32>, vector<2x8x8xf32>, vector<2x8x8xf32> -> vector<2x8x8xf32>
    %cst_42 = arith.constant -1.000000e-30 : f32
    "tpu.trace_stop"() : () -> ()
    %82 = vector.broadcast %cst_42 : f32 to vector<2x8x8xf32>
    %83 = arith.select %26, %82, %81 : vector<2x8x8xi1>, vector<2x8x8xf32>
    %cst_43 = arith.constant dense<0xFF800000> : vector<2x8xf32>
    %84 = vector.multi_reduction <maximumf>, %83, %cst_43 [2] : vector<2x8x8xf32> to vector<2x8xf32>
    %85 = vector.shape_cast %84 : vector<2x8xf32> to vector<2x8x1xf32>
    %86 = vector.broadcast %85 : vector<2x8x1xf32> to vector<2x8x8xf32>
    %87 = arith.subf %83, %86 : vector<2x8x8xf32>
    %88 = math.exp %87 : vector<2x8x8xf32>
    %cst_44 = arith.constant dense<0.000000e+00> : vector<2x8xf32>
    %89 = vector.multi_reduction <add>, %88, %cst_44 [2] : vector<2x8x8xf32> to vector<2x8xf32>
    %90 = vector.shape_cast %89 : vector<2x8xf32> to vector<2x8x1xf32>
    %91 = tpu.reciprocal %90 {approx = true} : vector<2x8x1xf32> -> vector<2x8x1xf32>
    %92 = vector.broadcast %91 : vector<2x8x1xf32> to vector<2x8x8xf32>
    %93 = arith.mulf %88, %92 : vector<2x8x8xf32>
    "tpu.trace_start"() <{level = 10 : i32, message = "bqk,bkd->bqd"}> : () -> ()
    %cst_45 = arith.constant dense<0.000000e+00> : vector<2x8x8xf32>
    %94 = tpu.matmul %93, %80, %cst_45 {dimension_numbers = #tpu.dot_dimension_numbers<[2], [1], [1], [2], [0, 0, 0, 1, 1, 2], [0], [0]>} : vector<2x8x8xf32>, vector<2x8x8xf32>, vector<2x8x8xf32> -> vector<2x8x8xf32>
    "tpu.trace_stop"() : () -> ()
    %95 = tpu.concatenate %43, %60, %77, %94 in 2 : vector<2x8x8xf32>, vector<2x8x8xf32>, vector<2x8x8xf32>, vector<2x8x8xf32> -> vector<2x8x32xf32>
    %96 = vector.shape_cast %95 : vector<2x8x32xf32> to vector<16x32xf32>
    %c0_46 = arith.constant 0 : index
    %c0_47 = arith.constant 0 : index
    %97 = vector.load %arg11[%c0_46, %c0_47] : memref<32x32xf32, #tpu.memory_space<vmem>>, vector<32x32xf32>
    %cst_48 = arith.constant dense<0.000000e+00> : vector<16x32xf32>
    %98 = tpu.matmul %96, %97, %cst_48 {dimension_numbers = #tpu.dot_dimension_numbers<[1], [0], [0], [1], [0, 0, 1, 1], [], []>} : vector<16x32xf32>, vector<32x32xf32>, vector<16x32xf32> -> vector<16x32xf32>
    %c0_49 = arith.constant 0 : index
    %c0_50 = arith.constant 0 : index
    %99 = vector.load %arg12[%c0_49, %c0_50] : memref<1x32xf32, #tpu.memory_space<vmem>>, vector<1x32xf32>
    %100 = vector.broadcast %99 : vector<1x32xf32> to vector<16x32xf32>
    %101 = arith.addf %98, %100 : vector<16x32xf32>
    %102 = vector.shape_cast %101 : vector<16x32xf32> to vector<2x8x32xf32>
    %c0_51 = arith.constant 0 : index
    %c0_52 = arith.constant 0 : index
    %c0_53 = arith.constant 0 : index
    %103 = vector.load %arg13[%c0_51, %c0_52, %c0_53] : memref<2x8x32xf32, #tpu.memory_space<vmem>>, vector<2x8x32xf32>
    tpu.vector_store %arg13[%c0_51, %c0_52, %c0_53], %102 {strides = array<i32>} : memref<2x8x32xf32, #tpu.memory_space<vmem>>, vector<2x8x32xf32>,
    return
  }
  func.func @transform_0(%arg0: i32) -> (i32, i32, i32) {
    %c0_i32 = arith.constant 0 : i32
    %c0_i32_0 = arith.constant 0 : i32
    %c0_i32_1 = arith.constant 0 : i32
    return %arg0, %c0_i32, %c0_i32_0 : i32, i32, i32
  }
  func.func @transform_1(%arg0: i32) -> (i32, i32, i32) {
    %c0_i32 = arith.constant 0 : i32
    %c0_i32_0 = arith.constant 0 : i32
    %c0_i32_1 = arith.constant 0 : i32
    return %arg0, %c0_i32, %c0_i32_0 : i32, i32, i32
  }
  func.func @transform_2(%arg0: i32) -> (i32, i32, i32) {
    %c0_i32 = arith.constant 0 : i32
    %c0_i32_0 = arith.constant 0 : i32
    %c0_i32_1 = arith.constant 0 : i32
    return %arg0, %c0_i32, %c0_i32_0 : i32, i32, i32
  }
  func.func @transform_3(%arg0: i32) -> (i32, i32, i32) {
    %c0_i32 = arith.constant 0 : i32
    %c0_i32_0 = arith.constant 0 : i32
    %c0_i32_1 = arith.constant 0 : i32
    return %arg0, %c0_i32, %c0_i32_0 : i32, i32, i32
  }
  func.func @transform_4(%arg0: i32) -> (i32, i32) {
    %c0_i32 = arith.constant 0 : i32
    %c0_i32_0 = arith.constant 0 : i32
    %c0_i32_1 = arith.constant 0 : i32
    return %c0_i32, %c0_i32_0 : i32, i32
  }
  func.func @transform_5(%arg0: i32) -> (i32, i32) {
    %c0_i32 = arith.constant 0 : i32
    %c0_i32_0 = arith.constant 0 : i32
    %c0_i32_1 = arith.constant 0 : i32
    return %c0_i32, %c0_i32_0 : i32, i32
  }
  func.func @transform_6(%arg0: i32) -> (i32, i32) {
    %c0_i32 = arith.constant 0 : i32
    %c0_i32_0 = arith.constant 0 : i32
    %c0_i32_1 = arith.constant 0 : i32
    return %c0_i32, %c0_i32_0 : i32, i32
  }
  func.func @transform_7(%arg0: i32) -> (i32, i32) {
    %c0_i32 = arith.constant 0 : i32
    %c0_i32_0 = arith.constant 0 : i32
    %c0_i32_1 = arith.constant 0 : i32
    return %c0_i32, %c0_i32_0 : i32, i32
  }
  func.func @transform_8(%arg0: i32) -> (i32, i32) {
    %c0_i32 = arith.constant 0 : i32
    %c0_i32_0 = arith.constant 0 : i32
    %c0_i32_1 = arith.constant 0 : i32
    return %c0_i32, %c0_i32_0 : i32, i32
  }
  func.func @transform_9(%arg0: i32) -> (i32, i32) {
    %c0_i32 = arith.constant 0 : i32
    %c0_i32_0 = arith.constant 0 : i32
    %c0_i32_1 = arith.constant 0 : i32
    return %c0_i32, %c0_i32_0 : i32, i32
  }
  func.func @transform_10(%arg0: i32) -> (i32, i32) {
    %c0_i32 = arith.constant 0 : i32
    %c0_i32_0 = arith.constant 0 : i32
    %c0_i32_1 = arith.constant 0 : i32
    return %c0_i32, %c0_i32_0 : i32, i32
  }
  func.func @transform_11(%arg0: i32) -> (i32, i32) {
    %c0_i32 = arith.constant 0 : i32
    %c0_i32_0 = arith.constant 0 : i32
    %c0_i32_1 = arith.constant 0 : i32
    return %c0_i32, %c0_i32_0 : i32, i32
  }
  func.func @transform_12(%arg0: i32) -> (i32, i32, i32) {
    %c0_i32 = arith.constant 0 : i32
    %c0_i32_0 = arith.constant 0 : i32
    %c0_i32_1 = arith.constant 0 : i32
    return %arg0, %c0_i32, %c0_i32_0 : i32, i32, i32
  }
}

</mosaic_0001>

<bundles_post_ra>
// kernel: tpu_custom_call.1
= control target key start
LH: loop header
LB: loop body
LE: loop exit
PB: predicated region body
PF: predicated region fallthrough
CT: control target
= control target key end

     0   :  { %17 = vsyncpa [#allocation3], 0  ;;  %s2811_s0 = inlined_call_operand.hbm [shape: f32[2,8,32], index: 0, kind: input, shape index: {}]   ;;  %s2812_s1 = inlined_call_operand.hbm [shape: f32[2,8,32], index: 1, kind: input, shape index: {}]   ;;  %s2813_s2 = inlined_call_operand.hbm [shape: f32[2,8,32], index: 2, kind: input, shape index: {}]   ;;  %s2814_s3 = inlined_call_operand.hbm [shape: f32[2,8,8], index: 3, kind: input, shape index: {}]   ;;  %s2815_s4 = inlined_call_operand.hbm [shape: f32[32,32], index: 4, kind: input, shape index: {}]   ;;  %s2816_s5 = inlined_call_operand.hbm [shape: f32[32,32], index: 5, kind: input, shape index: {}]   ;;  %s2817_s6 = inlined_call_operand.hbm [shape: f32[32,32], index: 6, kind: input, shape index: {}]   ;;  %s2818_s7 = inlined_call_operand.vmem [shape: f32[1,32], index: 7, kind: input, shape index: {}]   ;;  %s2819_s8 = inlined_call_operand.vmem [shape: f32[1,32], index: 8, kind: input, shape index: {}]   ;;  %s2820_s9 = inlined_call_operand.vmem [shape: f32[1,32], index: 9, kind: input, shape index: {}]   ;;  %s2821_s10 = inlined_call_operand.vmem [shape: f32[32,32], index: 10, kind: input, shape index: {}]   ;;  %s2822_s11 = inlined_call_operand.vmem [shape: f32[1,32], index: 11, kind: input, shape index: {}]   ;;  %s2823_s12 = inlined_call_operand.hbm [shape: f32[2,8,32], index: 12, kind: output, shape index: {}]  }
   0x1   :  { %18 = vsyncpa [#allocation6], 0 }
   0x2   :  { %19 = vsyncpa [#allocation9], 0 }
   0x3   :  { %20 = vsyncpa [#allocation12], 0 }
   0x4   :  { %21 = vsyncpa [#allocation4], 0  ;;  %s2374_s21 = smov [#allocation5]   ;;  %s2375_s23 = smov [#allocation8]  }
   0x5   :  { %s39_s22 = sshll.u32 %s2374_s21, 4  ;;  %s63_s24 = sshll.u32 %s2375_s23, 4  ;;  %s40_s22 = int_to_ptr.vmem [resolvable:$true] %s39_s22  ;;  %s2456_s24 = int_to_ptr.vmem [resolvable:$true] %s63_s24 }
   0x6   :  { %s2188_s27 = scalar_lea.hbm %s2812_s1, 256 }
   0x7   :  { %p2189_p0 = scmp.ne.s32.totalorder %s2812_s1, %s2188_s27  ;;  %p2192_p1 = scmp.lt.u32.totalorder %s2188_s27, %s2812_s1 }
   0x9   :  { %p2194_p2 = pnand %p2192_p1, %p2189_p0 }
   0xb   :  { %2197 = shalt.err (!%p2194_p2)
}
   0xc   :  { %s2198_s14 = scalar_lea.vmem %s40_s22, 256  ;;  %p2203_p4 = scmp.lt.s32.totalorder %s40_s22, %s40_s22 }
   0xd   :  { %p2199_p3 = scmp.ne.s32.totalorder %s40_s22, %s2198_s14  ;;  %p2204_p5 = scmp.lt.s32.totalorder %s2198_s14, %s2198_s14 }
   0xf   :  { %p2205_p6 = por %p2204_p5, %p2203_p4 }
  0x11   :  { %p2206_p7 = pnand %p2205_p6, %p2199_p3 }
  0x13   :  { %2209 = shalt.err (!%p2206_p7)
}
  0x14   :  { %s2376_s15 = smov 128   ;;  %s2377_s16 = smov 8  }
  0x15   :  { %45 = dma.hbm_to_vmem [thread:$0]  %s2812_s1, 256, %s40_s22, [#allocation6], %s2376_s15, %s2376_s15, %s2377_s16  }
  0x16   :  { %s2210_s21 = scalar_lea.hbm %s2814_s3, 256 }
  0x17   :  { %p2211_p8 = scmp.ne.s32.totalorder %s2814_s3, %s2210_s21  ;;  %p2214_p9 = scmp.lt.u32.totalorder %s2210_s21, %s2814_s3 }
  0x19   :  { %p2216_p10 = pnand %p2214_p9, %p2211_p8 }
  0x1b   :  { %2219 = shalt.err (!%p2216_p10)
}
  0x1c   :  { %s2220_s28 = scalar_lea.vmem %s2456_s24, 256  ;;  %p2225_p12 = scmp.lt.s32.totalorder %s2456_s24, %s2456_s24 }
  0x1d   :  { %p2221_p11 = scmp.ne.s32.totalorder %s2456_s24, %s2220_s28  ;;  %p2226_p13 = scmp.lt.s32.totalorder %s2220_s28, %s2220_s28 }
  0x1f   :  { %p2227_p0 = por %p2226_p13, %p2225_p12 }
  0x21   :  { %p2228_p1 = pnand %p2227_p0, %p2221_p11 }
  0x23   :  { %2231 = shalt.err (!%p2228_p1)
}
  0x24   :  { %69 = dma.hbm_to_vmem [thread:$0]  %s2814_s3, 256, %s2456_s24, [#allocation9], %s2376_s15, %s2376_s15, %s2377_s16  }
  0x25   :  { %s2378_s29 = smov [#allocation11]   ;;  %s2379_s13 = smov [#allocation2]  }
  0x26   :  { %s87_s30 = sshll.u32 %s2378_s29, 4  ;;  %s27_s14 = sshll.u32 %s2379_s13, 4  ;;  %s88_s30 = int_to_ptr.vmem [resolvable:$true] %s87_s30  ;;  %s2493_s14 = int_to_ptr.vmem [resolvable:$true] %s27_s14 }
  0x27   :  { %s2232_s19 = scalar_lea.hbm %s2816_s5, 512 }
  0x28   :  { %p2233_p2 = scmp.ne.s32.totalorder %s2816_s5, %s2232_s19  ;;  %p2236_p3 = scmp.lt.u32.totalorder %s2232_s19, %s2816_s5 }
  0x2a   :  { %p2238_p4 = pnand %p2236_p3, %p2233_p2 }
  0x2c   :  { %2241 = shalt.err (!%p2238_p4)
}
  0x2d   :  { %s2242_s3 = scalar_lea.vmem %s88_s30, 512  ;;  %p2247_p6 = scmp.lt.s32.totalorder %s88_s30, %s88_s30 }
  0x2e   :  { %p2243_p5 = scmp.ne.s32.totalorder %s88_s30, %s2242_s3  ;;  %p2248_p7 = scmp.lt.s32.totalorder %s2242_s3, %s2242_s3 }
  0x30   :  { %p2249_p8 = por %p2248_p7, %p2247_p6 }
  0x32   :  { %p2250_p9 = pnand %p2249_p8, %p2243_p5 }
  0x34   :  { %2253 = shalt.err (!%p2250_p9)
}
  0x35   :  { %93 = dma.hbm_to_vmem [thread:$0]  %s2816_s5, 512, %s88_s30, [#allocation12], %s2376_s15, %s2376_s15, %s2377_s16  }
  0x36   :  { %s2254_s1 = scalar_lea.hbm %s2811_s0, 256 }
  0x37   :  { %p2255_p10 = scmp.ne.s32.totalorder %s2811_s0, %s2254_s1  ;;  %p2258_p11 = scmp.lt.u32.totalorder %s2254_s1, %s2811_s0 }
  0x39   :  { %p2260_p12 = pnand %p2258_p11, %p2255_p10 }
  0x3b   :  { %2263 = shalt.err (!%p2260_p12)
}
  0x3c   :  { %s2264_s18 = scalar_lea.vmem %s2493_s14, 256  ;;  %p2269_p0 = scmp.lt.s32.totalorder %s2493_s14, %s2493_s14 }
  0x3d   :  { %p2265_p13 = scmp.ne.s32.totalorder %s2493_s14, %s2264_s18  ;;  %p2270_p1 = scmp.lt.s32.totalorder %s2264_s18, %s2264_s18 }
  0x3f   :  { %p2271_p2 = por %p2270_p1, %p2269_p0 }
  0x41   :  { %p2272_p3 = pnand %p2271_p2, %p2265_p13 }
  0x43   :  { %2275 = shalt.err (!%p2272_p3)
}
  0x44   :  { %33 = dma.hbm_to_vmem [thread:$0]  %s2811_s0, 256, %s2493_s14, [#allocation3], %s2376_s15, %s2376_s15, %s2377_s16  }
  0x45   :  { %s2380_s19 = smov [#allocation7]   ;;  %s2381_s21 = smov [#allocation10]  }
  0x46   :  { %s51_s20 = sshll.u32 %s2380_s19, 4  ;;  %s75_s23 = sshll.u32 %s2381_s21, 4  ;;  %s52_s20 = int_to_ptr.vmem [resolvable:$true] %s51_s20  ;;  %s2530_s23 = int_to_ptr.vmem [resolvable:$true] %s75_s23 }
  0x47   :  { %s2276_s24 = scalar_lea.hbm %s2813_s2, 256 }
  0x48   :  { %p2277_p4 = scmp.ne.s32.totalorder %s2813_s2, %s2276_s24  ;;  %p2280_p5 = scmp.lt.u32.totalorder %s2276_s24, %s2813_s2 }
  0x4a   :  { %p2282_p6 = pnand %p2280_p5, %p2277_p4 }
  0x4c   :  { %2285 = shalt.err (!%p2282_p6)
}
  0x4d   :  { %s2286_s0 = scalar_lea.vmem %s52_s20, 256  ;;  %p2291_p8 = scmp.lt.s32.totalorder %s52_s20, %s52_s20 }
  0x4e   :  { %p2287_p7 = scmp.ne.s32.totalorder %s52_s20, %s2286_s0  ;;  %p2292_p9 = scmp.lt.s32.totalorder %s2286_s0, %s2286_s0 }
  0x50   :  { %p2293_p10 = por %p2292_p9, %p2291_p8 }
  0x52   :  { %p2294_p11 = pnand %p2293_p10, %p2287_p7 }
  0x54   :  { %2297 = shalt.err (!%p2294_p11)
}
  0x55   :  { %57 = dma.hbm_to_vmem [thread:$0]  %s2813_s2, 256, %s52_s20, [#allocation6], %s2376_s15, %s2376_s15, %s2377_s16  }
  0x56   :  { %s2298_s17 = scalar_lea.hbm %s2815_s4, 512 }
  0x57   :  { %p2299_p12 = scmp.ne.s32.totalorder %s2815_s4, %s2298_s17  ;;  %p2302_p13 = scmp.lt.u32.totalorder %s2298_s17, %s2815_s4 }
  0x59   :  { %p2304_p0 = pnand %p2302_p13, %p2299_p12 }
  0x5b   :  { %2307 = shalt.err (!%p2304_p0)
}
  0x5c   :  { %s2308_s21 = scalar_lea.vmem %s2530_s23, 512  ;;  %p2313_p2 = scmp.lt.s32.totalorder %s2530_s23, %s2530_s23 }
  0x5d   :  { %p2309_p1 = scmp.ne.s32.totalorder %s2530_s23, %s2308_s21  ;;  %p2314_p3 = scmp.lt.s32.totalorder %s2308_s21, %s2308_s21 }
  0x5f   :  { %p2315_p4 = por %p2314_p3, %p2313_p2 }
  0x61   :  { %p2316_p5 = pnand %p2315_p4, %p2309_p1 }
  0x63   :  { %2319 = shalt.err (!%p2316_p5)
}
  0x64   :  { %81 = dma.hbm_to_vmem [thread:$0]  %s2815_s4, 512, %s2530_s23, [#allocation9], %s2376_s15, %s2376_s15, %s2377_s16  }
  0x65   :  { %s2382_s25 = smov [#allocation13]   ;;  %s2320_s27 = scalar_lea.hbm %s2817_s6, 512 }
  0x66   :  { %s99_s3 = sshll.u32 %s2382_s25, 4  ;;  %p2321_p6 = scmp.ne.s32.totalorder %s2817_s6, %s2320_s27  ;;  %s100_s3 = int_to_ptr.vmem [resolvable:$true] %s99_s3 }
  0x67   :  { %p2324_p7 = scmp.lt.u32.totalorder %s2320_s27, %s2817_s6 }
  0x69   :  { %p2326_p8 = pnand %p2324_p7, %p2321_p6 }
  0x6b   :  { %2329 = shalt.err (!%p2326_p8)
}
  0x6c   :  { %s2330_s22 = scalar_lea.vmem %s100_s3, 512  ;;  %p2335_p10 = scmp.lt.s32.totalorder %s100_s3, %s100_s3 }
  0x6d   :  { %p2331_p9 = scmp.ne.s32.totalorder %s100_s3, %s2330_s22  ;;  %p2336_p11 = scmp.lt.s32.totalorder %s2330_s22, %s2330_s22 }
  0x6f   :  { %p2337_p12 = por %p2336_p11, %p2335_p10 }
  0x71   :  { %p2338_p13 = pnand %p2337_p12, %p2331_p9 }
  0x73   :  { %2341 = shalt.err (!%p2338_p13)
}
  0x74   :  { %105 = dma.hbm_to_vmem [thread:$0]  %s2817_s6, 512, %s100_s3, [#allocation12], %s2376_s15, %s2376_s15, %s2377_s16  }
  0x75   :  { %2364 = dma.done.wait [#allocation3], 256  }
  0x76   :  { %2365 = vsyncadd [#allocation3], 4294967040 }
  0x77   :  { %2366 = dma.done.wait [#allocation6], 512  }
  0x78   :  { %2367 = vsyncadd [#allocation6], 4294966784 }
  0x79   :  { %2368 = dma.done.wait [#allocation9], 768  }
  0x7a   :  { %2369 = vsyncadd [#allocation9], 4294966528 }
  0x7b   :  { %2370 = dma.done.wait [#allocation12], 1024  }
  0x7c   :  { %2371 = vsyncadd [#allocation12], 4294966272  ;;  %v143_v0 = vld [vmem:[#allocation10] sm:$0xff]  ;;  %v144_v1 = vld [vmem:[#allocation10 + $0x8] sm:$0xff]  ;;  %vm154_vm0 = vcmask 261120   ;;  %v2383_v16 = vmov 0.0  }
  0x7d   :  { %v236_v2 = vld [vmem:[#allocation11] sm:$0xff]  ;;  %v2107_v3 = vpack.c.bf16 %v144_v1, %v143_v0  ;;  %v237_v4 = vld [vmem:[#allocation11 + $0x8] sm:$0xff]  ;;  %v145_v5 = vld [vmem:[#allocation10 + $0x10] sm:$0xff]  ;;  %vm2384_vm1 = vmmov 0   ;;  %vm424_vm2 = vcmask 64512   ;;  %s2385_s18 = smov 120  }
  0x7e   :  { %v146_v6 = vld [vmem:[#allocation10 + $0x18] sm:$0xff]  ;;  %v2115_v7 = vpack.c.bf16 %v237_v4, %v236_v2  ;;  %v238_v9 = vld [vmem:[#allocation11 + $0x10] sm:$0xff]  ;;  %v137_v11 = vld [vmem:[#allocation2] sm:$0xff]  ;;  %s2387_s5 = smov 104   ;;  %s2388_s30 = smov 16   ;;  %vm1774_vm5 = vcmask 195584  }
  0x7f   :  { %v2111_v8 = vpack.c.bf16 %v146_v6, %v145_v5  ;;  %v239_v10 = vld [vmem:[#allocation11 + $0x18] sm:$0xff]  ;;  %2108 = vmatprep.subr.bf16.mxu0 %v2107_v3  ;;  %1991 = vmatprep.mubr.msk.f32.mxu0 %vm154_vm0, %v137_v11  ;;  %v139_v13 = vld [vmem:[#allocation5] sm:$0xff]  ;;  %v138_v14 = vld [vmem:[#allocation2 + $0x8] sm:$0xff]  ;;  %s2389_s27 = smov 24   ;;  %vm1771_vm6 = vcmask 130048   ;;  %s2390_s1 = smov [#allocation14]  }
  0x80   :  { %v2119_v12 = vpack.c.bf16 %v239_v10, %v238_v9  ;;  %2110 = vmatpush3.bf16.msra.mxu0 %v2107_v3  ;;  %2116 = vmatprep.subr.bf16.mxu1 %v2115_v7  ;;  %v140_v15 = vld [vmem:[#allocation5 + $0x8] sm:$0xff]  ;;  %v1891_v17 = vld [vmem:[%s2818_s7] ss:$0 sm:$0xff]  ;;  %v329_v28 = vld [vmem:[#allocation13 + $0x8] sm:$0xff]  ;;  %s1876_s0 = sshll.u32 %s2390_s1, 4  ;;  %s1877_s0 = int_to_ptr.vmem [resolvable:$true] %s1876_s0 }
  0x81   :  { %2118 = vmatpush3.bf16.msra.mxu1 %v2115_v7  ;;  %2112 = vmatprep.subr.bf16.mxu0 %v2111_v8  ;;  %v1894_v19 = vld [vmem:[%s2819_s8] ss:$0 sm:$0xff]  ;;  %v330_v29 = vld [vmem:[#allocation13 + $0x10] sm:$0xff]  ;;  %v331_v31 = vld [vmem:[#allocation13 + $0x18] sm:$0xff]  ;;  %s2342_s14 = scalar_lea.vmem %s1877_s0, 256  ;;  %p2347_p1 = scmp.lt.s32.totalorder %s1877_s0, %s1877_s0 }
  0x82   :  { %2120 = vmatprep.subr.bf16.mxu1 %v2119_v12  ;;  %2002 = vmatprep.mubr.msk.f32.mxu1 %vm154_vm0, %v139_v13  ;;  %v328_v27 = vld [vmem:[#allocation13] sm:$0xff]  ;;  %v2127_v33 = vpack.c.bf16 %v331_v31, %v330_v29  ;;  %v142_v34 = vld [vmem:[#allocation7 + $0x8] sm:$0xff]  ;;  %v2626_v35 = vld [vmem:[#allocation8] sm:$0xff]  ;;  %p2343_p0 = scmp.ne.s32.totalorder %s1877_s0, %s2342_s14  ;;  %p2348_p2 = scmp.lt.s32.totalorder %s2342_s14, %s2342_s14 }
  0x83   :  { %v2123_v30 = vpack.c.bf16 %v329_v28, %v328_v27  ;;  %v141_v32 = vld [vmem:[#allocation7] sm:$0xff]  ;;  %vm422_vm3 = vcmp.eq.f32.partialorder %v2626_v35, 0.0  ;;  %v2629_v36 = vld [vmem:[#allocation8 + $0x8] sm:$0xff] }
  0x84   :  { %2114 = vmatpush3.bf16.msra.mxu0 %v2111_v8  ;;  %vm423_vm4 = vcmp.eq.f32.partialorder %v2629_v36, 0.0  ;;  %v1897_v59 = vld [vmem:[%s2820_s9] ss:$0 sm:$0xff]  ;;  %s2386_s9 = smov 112   ;;  %p2349_p3 = por %p2348_p2, %p2347_p1 }
  0x85   :  { %2122 = vmatpush3.bf16.msra.mxu1 %v2119_v12  ;;  %2124 = vmatprep.subr.bf16.mxu0 %v2123_v30 }
  0x86   :  { %2016 = vmatprep.subr.mxu1 %v2383_v16  ;;  %p2350_p4 = pnand %p2349_p3, %p2343_p0 }
  0x87   :  { %1992 = vmatmul.mubr.msk.f32.vlgmr.msra.gmra.mrb[0].mxu0 %vm154_vm0, %v138_v14 }
  0x88   :  { %2003 = vmatmul.mubr.msk.f32.vlgmr.msra.gmra.mrb[0].mxu1 %vm154_vm0, %v140_v15  ;;  %2013 = vmatprep.mubr.msk.f32.mxu0 %vm154_vm0, %v141_v32 }
  0x89   :  { %2018 = vmatprep.mubr.msk.f32.mxu1 %vm2384_vm1, %v2383_v16  ;;  %2126 = vmatpush3.bf16.msra.mxu0 %v2123_v30 }
  0x8a   :  { %2128 = vmatprep.subr.bf16.mxu0 %v2127_v33 }
  0x8d   :  { %2130 = vmatpush3.bf16.msra.mxu0 %v2127_v33 }
  0x8e   :  { %2036 = vmatprep.subr.mxu0 %v2383_v16 }
  0x90   :  { %2014 = vmatmul.mubr.msk.f32.vlgmr.msra.gmra.mrb[2].mxu0 %vm154_vm0, %v142_v34 }
  0x91   :  { %2038 = vmatprep.mubr.msk.f32.mxu0 %vm2384_vm1, %v2383_v16 }
 0x15a   :  { %v1993_v18 = vpop.f32.mrb[0].mxu0 }
 0x15b   :  { %v2595_v20 = vadd.f32 %v1993_v18, %v1891_v17  ;;  %v227_v21 = vpop.f32.mrb[1].mxu0  ;;  %v2004_v22 = vpop.f32.mrb[0].mxu1 }
 0x15c   :  { %v2597_v23 = vadd.f32 %v1891_v17, %v227_v21  ;;  %v319_v24 = vpop.f32.mrb[1].mxu1  ;;  %v2614_v26 = vadd.f32 %v2004_v22, %v1894_v19 }
 0x15d   :  { %v2599_v25 = vadd.f32 %v1894_v19, %v319_v24  ;;  %827 = vrot.lane.b32.xlu1 %v2595_v20, %s2385_s18 }
 0x15e   :  { %2017 = vmatpush3.xpose.msk.msra.mxu1 %vm424_vm2, %v2597_v23 }
 0x15f   :  { %2021 = vmatprep.subr.mxu1 %v2383_v16 }
 0x161   :  { %747 = vrot.lane.b32.xlu1 %v2599_v25, %s2385_s18  ;;  %2019 = vmatmul.mubr.msk.f32.vlgmr.msra.gmra.mrb[2].mxu1 %vm424_vm2, %v2599_v25 }
 0x162   :  { %2022 = vmatpush3.xpose.msk.msra.mxu1 %vm424_vm2, %v2595_v20  ;;  %2023 = vmatprep.mubr.msk.f32.mxu1 %vm2384_vm1, %v2383_v16 }
 0x163   :  { %2026 = vmatprep.subr.mxu1 %v2383_v16  ;;  %v2015_v58 = vpop.f32.mrb[2].mxu0 }
 0x164   :  { %v411_v60 = vpop.f32.mrb[3].mxu0  ;;  %v2652_v61 = vadd.f32 %v2015_v58, %v1897_v59 }
 0x165   :  { %2024 = vmatmul.mubr.msk.f32.vlgmr.msra.gmra.mrb[4].mxu1 %vm424_vm2, %v2614_v26  ;;  %v2654_v62 = vadd.f32 %v1897_v59, %v411_v60 }
 0x166   :  { %2028 = vmatprep.mubr.msk.f32.mxu1 %vm2384_vm1, %v2383_v16 }
 0x167   :  { %2027 = vmatpush3.msra.mxu1 %v2654_v62 }
 0x168   :  { %2031 = vmatprep.subr.mxu1 %v2383_v16 }
 0x1cf   :  { %v828_v49 = vpop.permute.xlu1 %827 }
 0x1d3   :  { %v748_v53 = vpop.permute.xlu1 %747 }
 0x234   :  { %v497_v37 = vpop.f32.mrb[2].mxu1 }
 0x235   :  { %v577_v38 = vsel %vm422_vm3, -1e-30, %v497_v37  ;;  %v2020_v39 = vpop.f32.mrb[3].mxu1 }
 0x236   :  { %v579_v40 = vsel %vm424_vm2, %v577_v38, -inf }
 0x237   :  { %580 = vmax.xlane.f32.xlu0 %v579_v40 }
 0x238   :  { %v573_v41 = vpop.f32.mrb[4].mxu1 }
 0x239   :  { %v578_v42 = vsel %vm423_vm4, -1e-30, %v573_v41  ;;  %v2025_v43 = vpop.f32.mrb[5].mxu1 }
 0x23a   :  { %v582_v44 = vsel %vm424_vm2, %v578_v42, -inf }
 0x23b   :  { %583 = vmax.xlane.f32.xlu0 %v582_v44 }
 0x251   :  { %749 = vrot.lane.b32.xlu0 %v2597_v23, %s2385_s18 }
 0x2c4   :  { %v581_v45 = vpop.xlane.xlu0 %580 }
 0x2c5   :  { %v585_v46 = vsub.f32 %v577_v38, %v581_v45 }
 0x2c7   :  { %v587_v47 = vmul.f32 1.442695, %v585_v46 }
 0x2c8   :  { %v584_v48 = vpop.xlane.xlu0 %583 }
 0x2c9   :  { %2156 = vpow2.f32 %v587_v47  ;;  %v586_v50 = vsub.f32 %v578_v42, %v584_v48 }
 0x2cb   :  { %v589_v51 = vmul.f32 1.442695, %v586_v50 }
 0x2cc   :  { %v750_v52 = vpop.permute.xlu0 %749 }
 0x2cd   :  { %2158 = vpow2.f32 %v589_v51  ;;  %2037 = vmatpush3.xpose.msk.msra.mxu0 %vm424_vm2, %v750_v52 }
 0x2ce   :  { %2046 = vmatprep.subr.mxu0 %v2383_v16 }
 0x2d0   :  { %2039 = vmatmul.mubr.msk.f32.vlgmr.msra.gmra.mrb[4].mxu0 %vm424_vm2, %v748_v53 }
 0x2d1   :  { %2048 = vmatprep.mubr.msk.f32.mxu0 %vm2384_vm1, %v2383_v16 }
 0x2d3   :  { %v2157_v54 = vpop.eup %2156 }
 0x2d4   :  { %v591_v55 = vsel %vm424_vm2, %v2157_v54, 0.0 }
 0x2d5   :  { %592 = vadd.xlane.f32.xlu1 %v591_v55 }
 0x2d7   :  { %v2159_v56 = vpop.eup %2158 }
 0x2d8   :  { %v594_v57 = vsel %vm424_vm2, %v2159_v56, 0.0 }
 0x2d9   :  { %595 = vadd.xlane.f32.xlu1 %v594_v57 }
 0x2ea   :  { %825 = vrot.lane.b32.xlu1 %v2614_v26, %s2385_s18 }
 0x362   :  { %v593_v63 = vpop.xlane.xlu1 %592 }
 0x363   :  { %2160 = vrcp.f32 %v593_v63 }
 0x366   :  { %v596_v0 = vpop.xlane.xlu1 %595 }
 0x367   :  { %2162 = vrcp.f32 %v596_v0 }
 0x36a   :  { %v826_v5 = vpop.permute.xlu1 %825 }
 0x36d   :  { %v2161_v1 = vpop.eup %2160 }
 0x36e   :  { %v599_v2 = vmul.f32 %v2161_v1, %v2157_v54 }
 0x370   :  { %2029 = vmatmul.mubr.msk.f32.vlgmr.msra.gmra.mrb[6].mxu1 %vm424_vm2, %v599_v2 }
 0x371   :  { %v2163_v3 = vpop.eup %2162  ;;  %2032 = vmatpush3.msra.mxu1 %v2652_v61  ;;  %2033 = vmatprep.mubr.msk.f32.mxu1 %vm2384_vm1, %v2383_v16 }
 0x372   :  { %v600_v4 = vmul.f32 %v2163_v3, %v2159_v56  ;;  %2041 = vmatprep.subr.mxu1 %v2383_v16 }
 0x374   :  { %2034 = vmatmul.mubr.msk.f32.vlgmr.msra.gmra.mrb[8].mxu1 %vm424_vm2, %v600_v4 }
 0x375   :  { %2043 = vmatprep.mubr.msk.f32.mxu1 %vm2384_vm1, %v2383_v16 }
 0x378   :  { %2042 = vmatpush3.xpose.msk.msra.mxu1 %vm424_vm2, %v828_v49 }
 0x379   :  { %2051 = vmatprep.subr.mxu1 %v2383_v16 }
 0x37b   :  { %2044 = vmatmul.mubr.msk.f32.vlgmr.msra.gmra.mrb[10].mxu1 %vm424_vm2, %v826_v5 }
 0x37c   :  { %2053 = vmatprep.mubr.msk.f32.mxu1 %vm2384_vm1, %v2383_v16 }
 0x3a3   :  { %v821_v6 = vpop.f32.mrb[4].mxu0 }
 0x3a4   :  { %v903_v7 = vsel %vm422_vm3, -1e-30, %v821_v6  ;;  %v2040_v8 = vpop.f32.mrb[5].mxu0 }
 0x3a5   :  { %v905_v9 = vsel %vm424_vm2, %v903_v7, -inf }
 0x3a6   :  { %906 = vmax.xlane.f32.xlu0 %v905_v9 }
 0x433   :  { %v907_v10 = vpop.xlane.xlu0 %906 }
 0x434   :  { %v911_v11 = vsub.f32 %v903_v7, %v907_v10 }
 0x436   :  { %v913_v12 = vmul.f32 1.442695, %v911_v11 }
 0x438   :  { %2164 = vpow2.f32 %v913_v12 }
 0x442   :  { %v2165_v13 = vpop.eup %2164 }
 0x443   :  { %v2674_v14 = vpop.f32.mrb[6].mxu1  ;;  %v917_v15 = vsel %vm424_vm2, %v2165_v13, 0.0 }
 0x444   :  { %918 = vadd.xlane.f32.xlu0 %v917_v15  ;;  %v2030_v17 = vpop.f32.mrb[7].mxu1 }
 0x447   :  { %v2677_v18 = vpop.f32.mrb[8].mxu1 }
 0x448   :  { %v2035_v19 = vpop.f32.mrb[9].mxu1 }
 0x44e   :  { %v899_v21 = vpop.f32.mrb[10].mxu1 }
 0x44f   :  { %v904_v22 = vsel %vm423_vm4, -1e-30, %v899_v21  ;;  %v2045_v24 = vpop.f32.mrb[11].mxu1 }
 0x450   :  { %v908_v27 = vsel %vm424_vm2, %v904_v22, -inf }
 0x451   :  { %909 = vmax.xlane.f32.xlu1 %v908_v27 }
 0x45a   :  { %928 = vrot.lane.b32.xlu0 %v2654_v62, %s2385_s18 }
 0x462   :  { %1005 = vrot.lane.b32.xlu1 %v2652_v61, %s2385_s18 }
 0x466   :  { %1083 = vrot.lane.b32.xlu1 %v2597_v23, %s2386_s9 }
 0x46a   :  { %1161 = vrot.lane.b32.xlu1 %v2595_v20, %s2386_s9 }
 0x46e   :  { %1159 = vrot.lane.b32.xlu1 %v2614_v26, %s2386_s9 }
 0x4d1   :  { %v919_v28 = vpop.xlane.xlu0 %918 }
 0x4d2   :  { %2166 = vrcp.f32 %v919_v28 }
 0x4d5   :  { %v929_v29 = vpop.permute.xlu0 %928 }
 0x4d6   :  { %2047 = vmatpush3.msra.mxu0 %v929_v29 }
 0x4d7   :  { %2056 = vmatprep.subr.mxu0 %v2383_v16 }
 0x4dc   :  { %v2167_v30 = vpop.eup %2166 }
 0x4dd   :  { %v925_v31 = vmul.f32 %v2167_v30, %v2165_v13 }
 0x4de   :  { %v910_v32 = vpop.xlane.xlu1 %909 }
 0x4df   :  { %v912_v33 = vsub.f32 %v904_v22, %v910_v32  ;;  %2049 = vmatmul.mubr.msk.f32.vlgmr.msra.gmra.mrb[6].mxu0 %vm424_vm2, %v925_v31 }
 0x4e0   :  { %2058 = vmatprep.mubr.msk.f32.mxu0 %vm2384_vm1, %v2383_v16 }
 0x4e1   :  { %v915_v34 = vmul.f32 1.442695, %v912_v33 }
 0x4e2   :  { %v1006_v37 = vpop.permute.xlu1 %1005 }
 0x4e3   :  { %2168 = vpow2.f32 %v915_v34  ;;  %2052 = vmatpush3.msra.mxu1 %v1006_v37 }
 0x4e4   :  { %2061 = vmatprep.subr.mxu1 %v2383_v16 }
 0x4e6   :  { %v1084_v38 = vpop.permute.xlu1 %1083 }
 0x4e7   :  { %2057 = vmatpush3.xpose.msk.msra.mxu0 %vm424_vm2, %v1084_v38 }
 0x4e8   :  { %2066 = vmatprep.subr.mxu0 %v2383_v16 }
 0x4ea   :  { %v1162_v44 = vpop.permute.xlu1 %1161 }
 0x4ed   :  { %v2169_v39 = vpop.eup %2168 }
 0x4ee   :  { %v920_v40 = vsel %vm424_vm2, %v2169_v39, 0.0  ;;  %v1160_v46 = vpop.permute.xlu1 %1159 }
 0x4ef   :  { %921 = vadd.xlane.f32.xlu0 %v920_v40 }
 0x505   :  { %1081 = vrot.lane.b32.xlu0 %v2599_v25, %s2386_s9 }
 0x57c   :  { %v922_v41 = vpop.xlane.xlu0 %921 }
 0x57d   :  { %2170 = vrcp.f32 %v922_v41 }
 0x580   :  { %v1082_v42 = vpop.permute.xlu0 %1081 }
 0x581   :  { %2059 = vmatmul.mubr.msk.f32.vlgmr.msra.gmra.mrb[8].mxu0 %vm424_vm2, %v1082_v42 }
 0x582   :  { %2068 = vmatprep.mubr.msk.f32.mxu0 %vm2384_vm1, %v2383_v16 }
 0x587   :  { %v2171_v43 = vpop.eup %2170 }
 0x588   :  { %v926_v45 = vmul.f32 %v2171_v43, %v2169_v39 }
 0x58a   :  { %2054 = vmatmul.mubr.msk.f32.vlgmr.msra.gmra.mrb[12].mxu1 %vm424_vm2, %v926_v45 }
 0x58b   :  { %2062 = vmatpush3.xpose.msk.msra.mxu1 %vm424_vm2, %v1162_v44  ;;  %2063 = vmatprep.mubr.msk.f32.mxu1 %vm2384_vm1, %v2383_v16 }
 0x58c   :  { %2071 = vmatprep.subr.mxu1 %v2383_v16 }
 0x58e   :  { %2064 = vmatmul.mubr.msk.f32.vlgmr.msra.gmra.mrb[14].mxu1 %vm424_vm2, %v1160_v46 }
 0x58f   :  { %2073 = vmatprep.mubr.msk.f32.mxu1 %vm2384_vm1, %v2383_v16 }
 0x5b2   :  { %v2713_v47 = vpop.f32.mrb[6].mxu0 }
 0x5b3   :  { %v2050_v48 = vpop.f32.mrb[7].mxu0 }
 0x654   :  { %v1155_v49 = vpop.f32.mrb[8].mxu0 }
 0x655   :  { %v1237_v50 = vsel %vm422_vm3, -1e-30, %v1155_v49  ;;  %v2060_v51 = vpop.f32.mrb[9].mxu0 }
 0x656   :  { %v1239_v52 = vsel %vm424_vm2, %v1237_v50, -inf }
 0x657   :  { %1240 = vmax.xlane.f32.xlu0 %v1239_v52  ;;  %v1779_v52 = vld [vmem:[%s2821_s10 + $0x10] sm:$0xff] }
 0x65d   :  { %v2718_v53 = vpop.f32.mrb[12].mxu1 }
 0x65e   :  { %v2055_v54 = vpop.f32.mrb[13].mxu1 }
 0x661   :  { %v1233_v55 = vpop.f32.mrb[14].mxu1 }
 0x662   :  { %v1238_v56 = vsel %vm423_vm4, -1e-30, %v1233_v55  ;;  %v2065_v57 = vpop.f32.mrb[15].mxu1 }
 0x663   :  { %v1242_v58 = vsel %vm424_vm2, %v1238_v56, -inf }
 0x664   :  { %1243 = vmax.xlane.f32.xlu1 %v1242_v58 }
 0x675   :  { %1337 = vrot.lane.b32.xlu1 %v2652_v61, %s2386_s9 }
 0x679   :  { %1415 = vrot.lane.b32.xlu1 %v2597_v23, %s2387_s5 }
 0x67d   :  { %1493 = vrot.lane.b32.xlu1 %v2595_v20, %s2387_s5 }
 0x681   :  { %1491 = vrot.lane.b32.xlu1 %v2614_v26, %s2387_s5 }
 0x6e4   :  { %v1241_v59 = vpop.xlane.xlu0 %1240 }
 0x6e5   :  { %v1245_v60 = vsub.f32 %v1237_v50, %v1241_v59  ;;  %v1777_v50 = vld [vmem:[%s2821_s10] sm:$0xff] }
 0x6e7   :  { %v1247_v63 = vmul.f32 1.442695, %v1245_v60 }
 0x6e9   :  { %2172 = vpow2.f32 %v1247_v63 }
 0x6f1   :  { %v1244_v0 = vpop.xlane.xlu1 %1243 }
 0x6f2   :  { %v1246_v20 = vsub.f32 %v1238_v56, %v1244_v0 }
 0x6f3   :  { %v2173_v1 = vpop.eup %2172 }
 0x6f4   :  { %v1251_v2 = vsel %vm424_vm2, %v2173_v1, 0.0  ;;  %v1249_v23 = vmul.f32 1.442695, %v1246_v20 }
 0x6f5   :  { %1252 = vadd.xlane.f32.xlu0 %v1251_v2  ;;  %v1338_v3 = vpop.permute.xlu1 %1337 }
 0x6f6   :  { %2072 = vmatpush3.msra.mxu1 %v1338_v3  ;;  %2174 = vpow2.f32 %v1249_v23 }
 0x6f7   :  { %2081 = vmatprep.subr.mxu1 %v2383_v16 }
 0x6f9   :  { %v1416_v9 = vpop.permute.xlu1 %1415 }
 0x6fd   :  { %v1494_v12 = vpop.permute.xlu1 %1493 }
 0x700   :  { %v2175_v26 = vpop.eup %2174 }
 0x701   :  { %v1254_v4 = vsel %vm424_vm2, %v2175_v26, 0.0  ;;  %v1492_v15 = vpop.permute.xlu1 %1491 }
 0x70b   :  { %1261 = vrot.lane.b32.xlu0 %v2654_v62, %s2386_s9 }
 0x72a   :  { %1255 = vadd.xlane.f32.xlu0 %v1254_v4 }
 0x740   :  { %1413 = vrot.lane.b32.xlu0 %v2599_v25, %s2387_s5 }
 0x782   :  { %v1253_v5 = vpop.xlane.xlu0 %1252 }
 0x783   :  { %2176 = vrcp.f32 %v1253_v5 }
 0x786   :  { %v1262_v6 = vpop.permute.xlu0 %1261 }
 0x787   :  { %2067 = vmatpush3.msra.mxu0 %v1262_v6  ;;  %v1924_v6 = vld [vmem:[%s2822_s11] ss:$0 sm:$0xff] }
 0x788   :  { %2076 = vmatprep.subr.mxu0 %v2383_v16 }
 0x78d   :  { %v2177_v7 = vpop.eup %2176 }
 0x78e   :  { %v1259_v8 = vmul.f32 %v2177_v7, %v2173_v1 }
 0x790   :  { %2069 = vmatmul.mubr.msk.f32.vlgmr.msra.gmra.mrb[10].mxu0 %vm424_vm2, %v1259_v8 }
 0x791   :  { %2077 = vmatpush3.xpose.msk.msra.mxu0 %vm424_vm2, %v1416_v9  ;;  %2078 = vmatprep.mubr.msk.f32.mxu0 %vm2384_vm1, %v2383_v16 }
 0x792   :  { %2086 = vmatprep.subr.mxu0 %v2383_v16 }
 0x7b7   :  { %v1256_v10 = vpop.xlane.xlu0 %1255 }
 0x7b8   :  { %2178 = vrcp.f32 %v1256_v10 }
 0x7bb   :  { %v1414_v25 = vpop.permute.xlu0 %1413 }
 0x7bc   :  { %2079 = vmatmul.mubr.msk.f32.vlgmr.msra.gmra.mrb[12].mxu0 %vm424_vm2, %v1414_v25 }
 0x7bd   :  { %2088 = vmatprep.mubr.msk.f32.mxu0 %vm2384_vm1, %v2383_v16 }
 0x7c2   :  { %v2179_v11 = vpop.eup %2178 }
 0x7c3   :  { %v1260_v13 = vmul.f32 %v2179_v11, %v2175_v26 }
 0x7c5   :  { %2074 = vmatmul.mubr.msk.f32.vlgmr.msra.gmra.mrb[16].mxu1 %vm424_vm2, %v1260_v13 }
 0x7c6   :  { %2082 = vmatpush3.xpose.msk.msra.mxu1 %vm424_vm2, %v1494_v12  ;;  %2083 = vmatprep.mubr.msk.f32.mxu1 %vm2384_vm1, %v2383_v16 }
 0x7c7   :  { %2091 = vmatprep.subr.mxu1 %v2383_v16 }
 0x7c9   :  { %2084 = vmatmul.mubr.msk.f32.vlgmr.msra.gmra.mrb[18].mxu1 %vm424_vm2, %v1492_v15 }
 0x7ca   :  { %2093 = vmatprep.mubr.msk.f32.mxu1 %vm2384_vm1, %v2383_v16 }
 0x863   :  { %v1333_v17 = vpop.f32.mrb[10].mxu0 }
 0x864   :  { %v2070_v19 = vpop.f32.mrb[11].mxu0 }
 0x88f   :  { %v1487_v21 = vpop.f32.mrb[12].mxu0 }
 0x890   :  { %v1569_v22 = vsel %vm422_vm3, -1e-30, %v1487_v21  ;;  %v2080_v24 = vpop.f32.mrb[13].mxu0 }
 0x891   :  { %v1571_v27 = vsel %vm424_vm2, %v1569_v22, -inf }
 0x892   :  { %1572 = vmax.xlane.f32.xlu0 %v1571_v27 }
 0x898   :  { %v1409_v28 = vpop.f32.mrb[16].mxu1 }
 0x899   :  { %v2075_v29 = vpop.f32.mrb[17].mxu1 }
 0x89c   :  { %v1565_v30 = vpop.f32.mrb[18].mxu1 }
 0x89d   :  { %v1570_v31 = vsel %vm423_vm4, -1e-30, %v1565_v30  ;;  %v2085_v32 = vpop.f32.mrb[19].mxu1 }
 0x89e   :  { %v1574_v33 = vsel %vm424_vm2, %v1570_v31, -inf }
 0x89f   :  { %1575 = vmax.xlane.f32.xlu1 %v1574_v33 }
 0x8b0   :  { %1669 = vrot.lane.b32.xlu1 %v2652_v61, %s2387_s5 }
 0x8b4   :  { %1747 = vrot.lane.b32.xlu1 %v2713_v47, %s2377_s16 }
 0x8b8   :  { %1749 = vrot.lane.b32.xlu1 %v2718_v53, %s2377_s16  ;;  %v1780_v53 = vld [vmem:[%s2821_s10 + $0x18] sm:$0xff] }
 0x8b9   :  { %v2135_v54 = vpack.c.bf16 %v1780_v53, %v1779_v52 }
 0x8bc   :  { %1757 = vrot.lane.b32.xlu1 %v1409_v28, %s2388_s30 }
 0x91f   :  { %v1573_v16 = vpop.xlane.xlu0 %1572 }
 0x920   :  { %v1577_v35 = vsub.f32 %v1569_v22, %v1573_v16 }
 0x922   :  { %v1579_v34 = vmul.f32 1.442695, %v1577_v35 }
 0x924   :  { %2180 = vpow2.f32 %v1579_v34 }
 0x92c   :  { %v1576_v36 = vpop.xlane.xlu1 %1575 }
 0x92d   :  { %v1578_v37 = vsub.f32 %v1570_v31, %v1576_v36 }
 0x92e   :  { %v2181_v38 = vpop.eup %2180 }
 0x92f   :  { %v1581_v39 = vmul.f32 1.442695, %v1578_v37  ;;  %v1583_v40 = vsel %vm424_vm2, %v2181_v38, 0.0 }
 0x930   :  { %1584 = vadd.xlane.f32.xlu0 %v1583_v40  ;;  %v1670_v61 = vpop.permute.xlu1 %1669 }
 0x931   :  { %2182 = vpow2.f32 %v1581_v39  ;;  %2092 = vmatpush3.msra.mxu1 %v1670_v61 }
 0x934   :  { %v1748_v59 = vpop.permute.xlu1 %1747 }
 0x935   :  { %v1769_v0 = vsel %vm424_vm2, %v2674_v14, %v1748_v59 }
 0x938   :  { %v1750_v63 = vpop.permute.xlu1 %1749 }
 0x939   :  { %v1770_v23 = vsel %vm424_vm2, %v2677_v18, %v1750_v63 }
 0x93b   :  { %v2183_v41 = vpop.eup %2182 }
 0x93c   :  { %v1586_v42 = vsel %vm424_vm2, %v2183_v41, 0.0  ;;  %v1758_v20 = vpop.permute.xlu1 %1757 }
 0x93d   :  { %1587 = vadd.xlane.f32.xlu0 %v1586_v42  ;;  %v1773_v26 = vsel %vm1771_vm6, %v1770_v23, %v1758_v20 }
 0x953   :  { %1593 = vrot.lane.b32.xlu0 %v2654_v62, %s2387_s5  ;;  %v1778_v62 = vld [vmem:[%s2821_s10 + $0x8] sm:$0xff] }
 0x954   :  { %v2131_v51 = vpack.c.bf16 %v1778_v62, %v1777_v50 }
 0x957   :  { %1755 = vrot.lane.b32.xlu0 %v1333_v17, %s2388_s30 }
 0x9bd   :  { %v1585_v43 = vpop.xlane.xlu0 %1584 }
 0x9be   :  { %2184 = vrcp.f32 %v1585_v43 }
 0x9c8   :  { %v2185_v45 = vpop.eup %2184 }
 0x9c9   :  { %v1591_v46 = vmul.f32 %v2185_v45, %v2181_v38 }
 0x9ca   :  { %v1588_v44 = vpop.xlane.xlu0 %1587 }
 0x9cb   :  { %2186 = vrcp.f32 %v1588_v44 }
 0x9ce   :  { %v1594_v47 = vpop.permute.xlu0 %1593 }
 0x9cf   :  { %2087 = vmatpush3.msra.mxu0 %v1594_v47 }
 0x9d0   :  { %2089 = vmatmul.mubr.msk.f32.vlgmr.msra.gmra.mrb[14].mxu0 %vm424_vm2, %v1591_v46  ;;  %2132 = vmatprep.subr.bf16.mxu0 %v2131_v51 }
 0x9d1   :  { %2134 = vmatpush3.bf16.msra.mxu0 %v2131_v51 }
 0x9d2   :  { %2136 = vmatprep.subr.bf16.mxu0 %v2135_v54  ;;  %v1756_v60 = vpop.permute.xlu0 %1755 }
 0x9d3   :  { %v1772_v1 = vsel %vm1771_vm6, %v1769_v0, %v1756_v60 }
 0x9d5   :  { %v2187_v48 = vpop.eup %2186  ;;  %2138 = vmatpush3.bf16.msra.mxu0 %v2135_v54 }
 0x9d6   :  { %v1592_v49 = vmul.f32 %v2187_v48, %v2183_v41 }
 0x9d8   :  { %2094 = vmatmul.mubr.msk.f32.vlgmr.msra.gmra.mrb[20].mxu1 %vm424_vm2, %v1592_v49 }
 0xaa3   :  { %v1665_v55 = vpop.f32.mrb[14].mxu0 }
 0xaa4   :  { %1763 = vrot.lane.b32.xlu0 %v1665_v55, %s2389_s27  ;;  %v2090_v56 = vpop.f32.mrb[15].mxu0 }
 0xaab   :  { %v1741_v57 = vpop.f32.mrb[20].mxu1 }
 0xaac   :  { %1765 = vrot.lane.b32.xlu1 %v1741_v57, %s2389_s27  ;;  %v2095_v58 = vpop.f32.mrb[21].mxu1 }
 0xb16   :  { %v1764_v2 = vpop.permute.xlu0 %1763 }
 0xb17   :  { %v1775_v3 = vsel %vm1774_vm5, %v1772_v1, %v1764_v2 }
 0xb18   :  { %2104 = vmatprep.mubr.msk.f32.mxu0 %vm154_vm0, %v1775_v3 }
 0xb1e   :  { %v1766_v4 = vpop.permute.xlu1 %1765 }
 0xb1f   :  { %v1776_v5 = vsel %vm1774_vm5, %v1773_v26, %v1766_v4 }
 0xb20   :  { %2105 = vmatmul.mubr.msk.f32.vlgmr.msra.gmra.mrb[16].mxu0 %vm154_vm0, %v1776_v5 }
 0xbf3   :  { %v2106_v14 = vpop.f32.mrb[16].mxu0 }
 0xbf4   :  { %v1866_v7 = vadd.f32 %v2106_v14, %v1924_v6  ;;  %v1860_v8 = vpop.f32.mrb[17].mxu0 }
 0xbf5   :  { %v1861_v9 = vadd.f32 %v1924_v6, %v1860_v8 }
 0xbf6   :  { %1870 = vst.msk [vmem:[#allocation14 + $0x8] sm:$0xff] %vm154_vm0, %v1866_v7 }
 0xbf7   :  { %1869 = vst.msk [vmem:[#allocation14] sm:$0xff] %vm154_vm0, %v1861_v9 }
 0xbf8   :  { %2353 = shalt.err (!%p2350_p4)
}
 0xbf9   :  { %s2354_s4 = scalar_lea.hbm %s2823_s12, 256 }
 0xbfa   :  { %p2355_p5 = scmp.ne.s32.totalorder %s2823_s12, %s2354_s4  ;;  %p2358_p6 = scmp.lt.u32.totalorder %s2354_s4, %s2823_s12 }
 0xbfc   :  { %p2360_p7 = pnand %p2358_p6, %p2355_p5 }
 0xbfe   :  { %2363 = shalt.err (!%p2360_p7)
}
 0xbff   :  { %1882 = dma.vmem_to_hbm [thread:$0]  %s1877_s0, 256, %s2823_s12, [#allocation4], %s2376_s15, %s2376_s15, %s2377_s16  }
 0xc00   :  { %2372 = dma.done.wait [#allocation4], 256  }
 0xc01   :  { %2373 = vsyncadd [#allocation4], 4294967040 }
 0xc02   :  { %1886 = vsyncpa [#allocation3], 1 }
 0xc03   :  { %1887 = vsyncpa [#allocation6], 1 }
 0xc04   :  { %1888 = vsyncpa [#allocation9], 1 }
 0xc05   :  { %1889 = vsyncpa [#allocation12], 1 }
 0xc06   :  { %1890 = vsyncpa [#allocation4], 1 }

</bundles_post_ra>
